<compile_context>
chip_gen: v7x
topology: tpu7x:2x2x1
jax: 0.10.0
libtpu: 0.0.40
codegen_flags: <defaults>
</compile_context>

<pallas_src>
import functools

import jax
import jax.numpy as jnp
from jax.experimental import pallas as pl
from jax.experimental.pallas import tpu as pltpu

LANE = 128          # TPU lane width
BF16_SUBLANE = 16   # bf16 sublane packing granularity for the contraction dim


def _round_up(n: int, m: int) -> int:
    return (n + m - 1) // m * m


def _cdiv(a: int, b: int) -> int:
    return (a + b - 1) // b


# --------------------------------------------------------------------------- kernel
def generator_kernel(xin_ref, w1_ref, b1_ref, w2_ref, b2_ref, w3_ref, b3_ref,
                     out_ref):
    bf16 = jnp.bfloat16
    f32 = jnp.float32

    # fc1: one full-sublane-K matmul (concat folded in at pack/wrapper time).
    xin = xin_ref[...].astype(bf16)              # no-op if streamed as bf16
    h = jnp.dot(xin, w1_ref[...], preferred_element_type=f32) + b1_ref[...]
    h = jnp.maximum(h, 0.0)

    # fc2 + ReLU
    h = jnp.dot(h.astype(bf16), w2_ref[...], preferred_element_type=f32) + b2_ref[...]
    h = jnp.maximum(h, 0.0)

    # fc3 + sigmoid.  sigmoid(o) = 1 / (1 + exp(-o)); exp and the reciprocal both
    # execute on the EUP slot, keeping VALU slots free for the bf16 packs.
    o = jnp.dot(h.astype(bf16), w3_ref[...], preferred_element_type=f32) + b3_ref[...]
    sig = pl.reciprocal(1.0 + jnp.exp(-o), approx=True)
    out_ref[...] = sig.astype(out_ref.dtype)     # bf16 store: half the write bytes


# --------------------------------------------------------------------------- wrapper
@functools.partial(jax.jit, static_argnames=("output_size", "block_b"))
def _generator_forward_impl(x, condition, phenotype, params, *, output_size, block_b):
    w1, b1 = params["w1"], params["b1"]
    w2, b2 = params["w2"], params["b2"]
    w3, b3 = params["w3"], params["b3"]

    B = x.shape[0]
    Kp = w1.shape[0]            # sublane-padded fc1 contraction dim
    op = w3.shape[1]            # lane-padded output width (multiple of 128)

    # Fold the concat here (tiny arrays) and zero-pad K to match the packed W1.
    xin = jnp.concatenate([x, condition, phenotype], axis=1)
    K = xin.shape[1]
    if Kp != K:
        xin = jnp.pad(xin, ((0, 0), (0, Kp - K)))

    # Batch tile: >=2 grid steps when B allows it (v7x megacore), tb a multiple of
    # 8, and tb chosen from cdiv(B, n_steps) so round_up(B, tb) wastes little.
    min_steps = 2 if B >= 16 else 1
    n_steps = max(_cdiv(B, block_b), min_steps)
    tb = _round_up(_cdiv(B, n_steps), 8)
    bp = _round_up(B, tb)
    if bp != B:
        xin = jnp.pad(xin, ((0, bp - B), (0, 0)))
    grid = (bp // tb,)

    def resident(arr):
        # Constant index_map -> stays VMEM-resident across the batch grid.
        return pl.BlockSpec(arr.shape, lambda i: (0, 0))

    out_padded = pl.pallas_call(
        generator_kernel,
        out_shape=jax.ShapeDtypeStruct((bp, op), jnp.bfloat16),
        grid_spec=pltpu.PrefetchScalarGridSpec(
            num_scalar_prefetch=0,
            grid=grid,
            in_specs=[
                pl.BlockSpec((tb, Kp), lambda i: (i, 0)),
                resident(w1), resident(b1),
                resident(w2), resident(b2),
                resident(w3), resident(b3),
            ],
            out_specs=pl.BlockSpec((tb, op), lambda i: (i, 0)),
        ),
        compiler_params=pltpu.CompilerParams(
            dimension_semantics=("parallel",),
            vmem_limit_bytes=32 * 1024 * 1024,
        ),
    )(xin, w1, b1, w2, b2, w3, b3)

    # Slice away batch padding and lane padding; cast the small result back to f32.
    return out_padded[:B, :output_size].astype(jnp.float32)


def generator_forward(x, condition, phenotype, packed, *, block_b=512):
    # Keep the Python-int output_size out of the jitted pytree (static arg instead).
    params = {k: v for k, v in packed.items() if k != "output_size"}
    return _generator_forward_impl(
        x, condition, phenotype, params,
        output_size=int(packed["output_size"]), block_b=int(block_b))


# --------------------------------------------------------------------------- params
def init_generator_params(key, input_size, n_covariates, hidden_size, output_size):
    """PyTorch nn.Linear-style init (uniform +-1/sqrt(fan_in)).

    Returns raw f32 params: W stored as (in_features, out_features) == weight.T,
    biases as (out_features,).
    """
    in1 = input_size + n_covariates
    dims = [(in1, hidden_size), (hidden_size, hidden_size), (hidden_size, output_size)]
    keys = jax.random.split(key, 2 * len(dims))
    params = []
    for i, (fan_in, fan_out) in enumerate(dims):
        bound = 1.0 / (fan_in ** 0.5)
        w = jax.random.uniform(keys[2 * i], (fan_in, fan_out), jnp.float32, -bound, bound)
        b = jax.random.uniform(keys[2 * i + 1], (fan_out,), jnp.float32, -bound, bound)
        params += [w, b]
    return tuple(params)


def pack_generator_params(raw_params):
    """Zero-pad K to a bf16 sublane multiple, hidden/output to 128 lanes, cast bf16."""
    w1, b1, w2, b2, w3, b3 = raw_params
    in1, hidden = w1.shape
    out = w3.shape[1]
    Kp = _round_up(in1, BF16_SUBLANE)
    hp = _round_up(hidden, LANE)
    op = _round_up(out, LANE)
    bf16 = jnp.bfloat16

    return dict(
        w1=jnp.pad(w1, ((0, Kp - in1), (0, hp - hidden))).astype(bf16),
        b1=jnp.pad(b1, (0, hp - hidden)).reshape(1, hp).astype(jnp.float32),
        w2=jnp.pad(w2, ((0, hp - hidden), (0, hp - hidden))).astype(bf16),
        b2=jnp.pad(b2, (0, hp - hidden)).reshape(1, hp).astype(jnp.float32),
        w3=jnp.pad(w3, ((0, hp - hidden), (0, op - out))).astype(bf16),
        b3=jnp.pad(b3, (0, op - out)).reshape(1, op).astype(jnp.float32),
        output_size=out,
    )


# --------------------------------------------------------------------------- reference
def generator_reference(x, condition, phenotype, raw_params):
    """Pure-JAX f32 reference mirroring the PyTorch forward."""
    w1, b1, w2, b2, w3, b3 = raw_params
    xin = jnp.concatenate([x, condition, phenotype], axis=1)
    h = jax.nn.relu(xin @ w1 + b1)
    h = jax.nn.relu(h @ w2 + b2)
    return jax.nn.sigmoid(h @ w3 + b3)


# --------------------------------------------------------------------------- demo
if __name__ == "__main__":
    batch = 8
    input_size = 16      # latent / noise dim
    cond_dim = 8         # condition features
    pheno_dim = 8        # phenotype features
    n_covariates = cond_dim + pheno_dim
    hidden_size = 32
    output_size = 16

    key = jax.random.PRNGKey(0)
    k_x, k_c, k_p, k_params = jax.random.split(key, 4)

    x = jax.random.normal(k_x, (batch, input_size), jnp.float32)
    condition = jax.random.normal(k_c, (batch, cond_dim), jnp.float32)
    phenotype = jax.random.normal(k_p, (batch, pheno_dim), jnp.float32)

    raw_params = init_generator_params(k_params, input_size, n_covariates,
                                       hidden_size, output_size)
    packed = pack_generator_params(raw_params)

    out = generator_forward(x, condition, phenotype, packed)
    out = jax.block_until_ready(out)

    ref = generator_reference(x, condition, phenotype, raw_params)
    assert out.shape == (batch, output_size), out.shape
    # bf16 matmul/store path vs f32 reference: loosened tolerance (outputs in [0, 1]).
    assert jnp.allclose(out, ref, atol=2e-2, rtol=2e-2), "mismatch vs reference"
    assert bool(jnp.all(jnp.isfinite(out)))

    print("KERNEL_OK")
</pallas_src>

<mosaic_0001>
module attributes {stable_mosaic.version = 11 : i64} {
  func.func @generator_kernel(%arg0: i32, %arg1: memref<8x32xf32, #tpu.memory_space<vmem>>, %arg2: memref<32x128xbf16, #tpu.memory_space<vmem>>, %arg3: memref<1x128xf32, #tpu.memory_space<vmem>>, %arg4: memref<128x128xbf16, #tpu.memory_space<vmem>>, %arg5: memref<1x128xf32, #tpu.memory_space<vmem>>, %arg6: memref<128x128xbf16, #tpu.memory_space<vmem>>, %arg7: memref<1x128xf32, #tpu.memory_space<vmem>>, %arg8: memref<8x128xbf16, #tpu.memory_space<vmem>>) attributes {dimension_semantics = [#tpu.dimension_semantics<parallel>], iteration_bounds = array<i64: 1>, scalar_prefetch = 0 : i64, scratch_operands = 0 : i64, tpu.core_type = #tpu.core_type<tc>, window_params = [{transform_indices = @transform_0, window_bounds = array<i64: 8, 32>}, {pipeline_mode = #tpu.pipeline_mode<synchronous>, transform_indices = @transform_1, window_bounds = array<i64: 32, 128>}, {pipeline_mode = #tpu.pipeline_mode<synchronous>, transform_indices = @transform_2, window_bounds = array<i64: 1, 128>}, {pipeline_mode = #tpu.pipeline_mode<synchronous>, transform_indices = @transform_3, window_bounds = array<i64: 128, 128>}, {pipeline_mode = #tpu.pipeline_mode<synchronous>, transform_indices = @transform_4, window_bounds = array<i64: 1, 128>}, {pipeline_mode = #tpu.pipeline_mode<synchronous>, transform_indices = @transform_5, window_bounds = array<i64: 128, 128>}, {pipeline_mode = #tpu.pipeline_mode<synchronous>, transform_indices = @transform_6, window_bounds = array<i64: 1, 128>}, {transform_indices = @transform_7, window_bounds = array<i64: 8, 128>}]} {
    %c0 = arith.constant 0 : index
    %c0_0 = arith.constant 0 : index
    %0 = vector.load %arg1[%c0, %c0_0] : memref<8x32xf32, #tpu.memory_space<vmem>>, vector<8x32xf32>
    %1 = arith.truncf %0 : vector<8x32xf32> to vector<8x32xbf16>
    %c0_1 = arith.constant 0 : index
    %c0_2 = arith.constant 0 : index
    %2 = vector.load %arg2[%c0_1, %c0_2] : memref<32x128xbf16, #tpu.memory_space<vmem>>, vector<32x128xbf16>
    %cst = arith.constant dense<0.000000e+00> : vector<8x128xf32>
    %3 = tpu.matmul %1, %2, %cst {dimension_numbers = #tpu.dot_dimension_numbers<[1], [0], [0], [1], [0, 0, 1, 1], [], []>} : vector<8x32xbf16>, vector<32x128xbf16>, vector<8x128xf32> -> vector<8x128xf32>
    %c0_3 = arith.constant 0 : index
    %c0_4 = arith.constant 0 : index
    %4 = vector.load %arg3[%c0_3, %c0_4] : memref<1x128xf32, #tpu.memory_space<vmem>>, vector<1x128xf32>
    %5 = vector.broadcast %4 : vector<1x128xf32> to vector<8x128xf32>
    %6 = arith.addf %3, %5 : vector<8x128xf32>
    %cst_5 = arith.constant 0.000000e+00 : f32
    %7 = vector.broadcast %cst_5 : f32 to vector<8x128xf32>
    %8 = arith.maximumf %6, %7 : vector<8x128xf32>
    %9 = arith.truncf %8 : vector<8x128xf32> to vector<8x128xbf16>
    %c0_6 = arith.constant 0 : index
    %c0_7 = arith.constant 0 : index
    %10 = vector.load %arg4[%c0_6, %c0_7] : memref<128x128xbf16, #tpu.memory_space<vmem>>, vector<128x128xbf16>
    %cst_8 = arith.constant dense<0.000000e+00> : vector<8x128xf32>
    %11 = tpu.matmul %9, %10, %cst_8 {dimension_numbers = #tpu.dot_dimension_numbers<[1], [0], [0], [1], [0, 0, 1, 1], [], []>} : vector<8x128xbf16>, vector<128x128xbf16>, vector<8x128xf32> -> vector<8x128xf32>
    %c0_9 = arith.constant 0 : index
    %c0_10 = arith.constant 0 : index
    %12 = vector.load %arg5[%c0_9, %c0_10] : memref<1x128xf32, #tpu.memory_space<vmem>>, vector<1x128xf32>
    %13 = vector.broadcast %12 : vector<1x128xf32> to vector<8x128xf32>
    %14 = arith.addf %11, %13 : vector<8x128xf32>
    %cst_11 = arith.constant 0.000000e+00 : f32
    %15 = vector.broadcast %cst_11 : f32 to vector<8x128xf32>
    %16 = arith.maximumf %14, %15 : vector<8x128xf32>
    %17 = arith.truncf %16 : vector<8x128xf32> to vector<8x128xbf16>
    %c0_12 = arith.constant 0 : index
    %c0_13 = arith.constant 0 : index
    %18 = vector.load %arg6[%c0_12, %c0_13] : memref<128x128xbf16, #tpu.memory_space<vmem>>, vector<128x128xbf16>
    %cst_14 = arith.constant dense<0.000000e+00> : vector<8x128xf32>
    %19 = tpu.matmul %17, %18, %cst_14 {dimension_numbers = #tpu.dot_dimension_numbers<[1], [0], [0], [1], [0, 0, 1, 1], [], []>} : vector<8x128xbf16>, vector<128x128xbf16>, vector<8x128xf32> -> vector<8x128xf32>
    %c0_15 = arith.constant 0 : index
    %c0_16 = arith.constant 0 : index
    %20 = vector.load %arg7[%c0_15, %c0_16] : memref<1x128xf32, #tpu.memory_space<vmem>>, vector<1x128xf32>
    %21 = vector.broadcast %20 : vector<1x128xf32> to vector<8x128xf32>
    %22 = arith.addf %19, %21 : vector<8x128xf32>
    %cst_17 = arith.constant 0.000000e+00 : f32
    %23 = vector.broadcast %cst_17 : f32 to vector<8x128xf32>
    %24 = arith.subf %23, %22 : vector<8x128xf32>
    %25 = math.exp %24 : vector<8x128xf32>
    %cst_18 = arith.constant 1.000000e+00 : f32
    %26 = vector.broadcast %cst_18 : f32 to vector<8x128xf32>
    %27 = arith.addf %26, %25 : vector<8x128xf32>
    %28 = tpu.reciprocal %27 {approx = true} : vector<8x128xf32> -> vector<8x128xf32>
    %29 = arith.truncf %28 : vector<8x128xf32> to vector<8x128xbf16>
    %c0_19 = arith.constant 0 : index
    %c0_20 = arith.constant 0 : index
    %30 = vector.load %arg8[%c0_19, %c0_20] : memref<8x128xbf16, #tpu.memory_space<vmem>>, vector<8x128xbf16>
    tpu.vector_store %arg8[%c0_19, %c0_20], %29 {strides = array<i32>} : memref<8x128xbf16, #tpu.memory_space<vmem>>, vector<8x128xbf16>,
    return
  }
  func.func @transform_0(%arg0: i32) -> (i32, i32) {
    %c0_i32 = arith.constant 0 : i32
    %c0_i32_0 = arith.constant 0 : i32
    return %arg0, %c0_i32 : i32, i32
  }
  func.func @transform_1(%arg0: i32) -> (i32, i32) {
    %c0_i32 = arith.constant 0 : i32
    %c0_i32_0 = arith.constant 0 : i32
    %c0_i32_1 = arith.constant 0 : i32
    return %c0_i32, %c0_i32_0 : i32, i32
  }
  func.func @transform_2(%arg0: i32) -> (i32, i32) {
    %c0_i32 = arith.constant 0 : i32
    %c0_i32_0 = arith.constant 0 : i32
    %c0_i32_1 = arith.constant 0 : i32
    return %c0_i32, %c0_i32_0 : i32, i32
  }
  func.func @transform_3(%arg0: i32) -> (i32, i32) {
    %c0_i32 = arith.constant 0 : i32
    %c0_i32_0 = arith.constant 0 : i32
    %c0_i32_1 = arith.constant 0 : i32
    return %c0_i32, %c0_i32_0 : i32, i32
  }
  func.func @transform_4(%arg0: i32) -> (i32, i32) {
    %c0_i32 = arith.constant 0 : i32
    %c0_i32_0 = arith.constant 0 : i32
    %c0_i32_1 = arith.constant 0 : i32
    return %c0_i32, %c0_i32_0 : i32, i32
  }
  func.func @transform_5(%arg0: i32) -> (i32, i32) {
    %c0_i32 = arith.constant 0 : i32
    %c0_i32_0 = arith.constant 0 : i32
    %c0_i32_1 = arith.constant 0 : i32
    return %c0_i32, %c0_i32_0 : i32, i32
  }
  func.func @transform_6(%arg0: i32) -> (i32, i32) {
    %c0_i32 = arith.constant 0 : i32
    %c0_i32_0 = arith.constant 0 : i32
    %c0_i32_1 = arith.constant 0 : i32
    return %c0_i32, %c0_i32_0 : i32, i32
  }
  func.func @transform_7(%arg0: i32) -> (i32, i32) {
    %c0_i32 = arith.constant 0 : i32
    %c0_i32_0 = arith.constant 0 : i32
    return %arg0, %c0_i32 : i32, i32
  }
}

</mosaic_0001>

<bundles_post_ra>
// kernel: _generator_forward_impl.1
= control target key start
LH: loop header
LB: loop body
LE: loop exit
PB: predicated region body
PF: predicated region fallthrough
CT: control target
= control target key end

     0   :  { %12 = vsyncpa [#allocation3], 0  ;;  %s645_s0 = inlined_call_operand.vmem [shape: f32[8,32], index: 0, kind: input, shape index: {}]   ;;  %s646_s1 = inlined_call_operand.vmem [shape: bf16[32,128], index: 1, kind: input, shape index: {}]   ;;  %s647_s2 = inlined_call_operand.vmem [shape: f32[1,128], index: 2, kind: input, shape index: {}]   ;;  %s648_s3 = inlined_call_operand.hbm [shape: bf16[128,128], index: 3, kind: input, shape index: {}]   ;;  %s649_s4 = inlined_call_operand.vmem [shape: f32[1,128], index: 4, kind: input, shape index: {}]   ;;  %s650_s5 = inlined_call_operand.hbm [shape: bf16[128,128], index: 5, kind: input, shape index: {}]   ;;  %s651_s6 = inlined_call_operand.vmem [shape: f32[1,128], index: 6, kind: input, shape index: {}]   ;;  %s652_s7 = inlined_call_operand.vmem [shape: bf16[8,128], index: 7, kind: output, shape index: {}]  }
   0x1   :  { %13 = vsyncpa [#allocation5], 0  ;;  %s530_s24 = smov [#allocation2]   ;;  %s482_s28 = scalar_lea.hbm %s648_s3, 1024 }
   0x2   :  { %s25_s25 = sshll.u32 %s530_s24, 4  ;;  %p483_p0 = scmp.ne.s32.totalorder %s648_s3, %s482_s28  ;;  %s26_s25 = int_to_ptr.vmem [resolvable:$true] %s25_s25 }
   0x3   :  { %p486_p1 = scmp.lt.u32.totalorder %s482_s28, %s648_s3 }
   0x5   :  { %p488_p2 = pnand %p486_p1, %p483_p0 }
   0x7   :  { %491 = shalt.err (!%p488_p2)
}
   0x8   :  { %s492_s10 = scalar_lea.vmem %s26_s25, 1024  ;;  %p497_p4 = scmp.lt.s32.totalorder %s26_s25, %s26_s25 }
   0x9   :  { %p493_p3 = scmp.ne.s32.totalorder %s26_s25, %s492_s10  ;;  %p498_p5 = scmp.lt.s32.totalorder %s492_s10, %s492_s10 }
   0xb   :  { %p499_p6 = por %p498_p5, %p497_p4 }
   0xd   :  { %p500_p7 = pnand %p499_p6, %p493_p3 }
   0xf   :  { %503 = shalt.err (!%p500_p7)
}
  0x10   :  { %s531_s11 = smov 64   ;;  %s532_s12 = smov 4  }
  0x11   :  { %31 = dma.hbm_to_vmem [thread:$0]  %s648_s3, 1024, %s26_s25, [#allocation3], %s531_s11, %s531_s11, %s532_s12  }
  0x12   :  { %s533_s15 = smov [#allocation4]   ;;  %s504_s19 = scalar_lea.hbm %s650_s5, 1024 }
  0x13   :  { %s39_s16 = sshll.u32 %s533_s15, 4  ;;  %p505_p8 = scmp.ne.s32.totalorder %s650_s5, %s504_s19  ;;  %s40_s16 = int_to_ptr.vmem [resolvable:$true] %s39_s16 }
  0x14   :  { %p508_p9 = scmp.lt.u32.totalorder %s504_s19, %s650_s5 }
  0x16   :  { %p510_p10 = pnand %p508_p9, %p505_p8 }
  0x18   :  { %513 = shalt.err (!%p510_p10)
}
  0x19   :  { %s514_s24 = scalar_lea.vmem %s40_s16, 1024  ;;  %p519_p12 = scmp.lt.s32.totalorder %s40_s16, %s40_s16 }
  0x1a   :  { %p515_p11 = scmp.ne.s32.totalorder %s40_s16, %s514_s24  ;;  %p520_p13 = scmp.lt.s32.totalorder %s514_s24, %s514_s24 }
  0x1c   :  { %p521_p0 = por %p520_p13, %p519_p12 }
  0x1e   :  { %p522_p1 = pnand %p521_p0, %p515_p11 }
  0x20   :  { %525 = shalt.err (!%p522_p1)
}
  0x21   :  { %45 = dma.hbm_to_vmem [thread:$0]  %s650_s5, 1024, %s40_s16, [#allocation5], %s531_s11, %s531_s11, %s532_s12  }
  0x22   :  { %526 = dma.done.wait [#allocation3], 1024  }
  0x23   :  { %527 = vsyncadd [#allocation3], 4294966272 }
  0x24   :  { %528 = dma.done.wait [#allocation5], 1024  }
  0x25   :  { %529 = vsyncadd [#allocation5], 4294966272  ;;  %v534_v0 = vmov 0.0   ;;  %vm535_vm0 = vmmov 0   ;;  %v460_v1 = vld [vmem:[%s646_s1] sm:$0xff]   ;;  %v461_v2 = vld [vmem:[%s646_s1 + $0x8] sm:$0xff]  }
  0x26   :  { %406 = vmatprep.subr.bf16.mxu0 %v534_v0  ;;  %410 = vmatprep.mubr.msk.bf16.mxu0 %vm535_vm0, %v534_v0  ;;  %v55_v3 = vld [vmem:[%s645_s0] sm:$0xff]  ;;  %v463_v6 = vld [vmem:[#allocation2 + $0x8] sm:$0xff]   ;;  %vm80_vm1 = vcmask 261120   ;;  %v464_v7 = vld [vmem:[#allocation2 + $0x10] sm:$0xff]  }
  0x27   :  { %414 = vmatprep.subr.bf16.mxu1 %v534_v0  ;;  %430 = vmatprep.mubr.msk.bf16.mxu1 %vm535_vm0, %v534_v0  ;;  %v462_v4 = vld [vmem:[#allocation2] sm:$0xff]   ;;  %v56_v5 = vpack.c.bf16 %v55_v3, %v55_v3  ;;  %v465_v8 = vld [vmem:[#allocation2 + $0x18] sm:$0xff]   ;;  %v467_v10 = vld [vmem:[#allocation2 + $0x28] sm:$0xff]  }
  0x28   :  { %407 = vmatpush3.bf16.msra.mxu0 %v460_v1  ;;  %415 = vmatpush3.bf16.msra.mxu1 %v462_v4  ;;  %v466_v9 = vld [vmem:[#allocation2 + $0x20] sm:$0xff]   ;;  %v468_v11 = vld [vmem:[#allocation2 + $0x30] sm:$0xff]   ;;  %v469_v12 = vld [vmem:[#allocation2 + $0x38] sm:$0xff]  }
  0x29   :  { %408 = vmatprep.subr.bf16.mxu0 %v534_v0  ;;  %416 = vmatprep.subr.bf16.mxu1 %v534_v0  ;;  %v470_v13 = vld [vmem:[#allocation4] sm:$0xff]   ;;  %v471_v14 = vld [vmem:[#allocation4 + $0x8] sm:$0xff]   ;;  %v472_v15 = vld [vmem:[#allocation4 + $0x10] sm:$0xff]  }
  0x2a   :  { %v473_v16 = vld [vmem:[#allocation4 + $0x18] sm:$0xff]   ;;  %v474_v17 = vld [vmem:[#allocation4 + $0x20] sm:$0xff]   ;;  %v475_v18 = vld [vmem:[#allocation4 + $0x28] sm:$0xff]  }
  0x2b   :  { %v363_v19 = vld [vmem:[%s647_s2] ss:$0 sm:$0xff]  ;;  %v476_v27 = vld [vmem:[#allocation4 + $0x30] sm:$0xff]   ;;  %v477_v28 = vld [vmem:[#allocation4 + $0x38] sm:$0xff]  }
  0x2c   :  { %409 = vmatpush3.bf16.msra.mxu0 %v461_v2  ;;  %417 = vmatpush3.bf16.msra.mxu1 %v463_v6  ;;  %v367_v29 = vld [vmem:[%s649_s4] ss:$0 sm:$0xff] }
  0x2d   :  { %434 = vmatprep.subr.bf16.mxu0 %v534_v0  ;;  %418 = vmatprep.subr.bf16.mxu1 %v534_v0  ;;  %v376_v37 = vld [vmem:[%s651_s6] ss:$0 sm:$0xff] }
  0x2f   :  { %411 = vmatmul.mubr.msk.bf16.vlgmr.msra.gmra.mrb[0].mxu0 %vm80_vm1, %v56_v5 }
  0x30   :  { %450 = vmatprep.mubr.msk.bf16.mxu0 %vm535_vm0, %v534_v0  ;;  %419 = vmatpush3.bf16.msra.mxu1 %v464_v7 }
  0x31   :  { %420 = vmatprep.subr.bf16.mxu1 %v534_v0  ;;  %435 = vmatpush3.bf16.msra.mxu0 %v470_v13 }
  0x32   :  { %436 = vmatprep.subr.bf16.mxu0 %v534_v0 }
  0x34   :  { %421 = vmatpush3.bf16.msra.mxu1 %v465_v8 }
  0x35   :  { %422 = vmatprep.subr.bf16.mxu1 %v534_v0  ;;  %437 = vmatpush3.bf16.msra.mxu0 %v471_v14 }
  0x36   :  { %438 = vmatprep.subr.bf16.mxu0 %v534_v0 }
  0x38   :  { %423 = vmatpush3.bf16.msra.mxu1 %v466_v9 }
  0x39   :  { %424 = vmatprep.subr.bf16.mxu1 %v534_v0  ;;  %439 = vmatpush3.bf16.msra.mxu0 %v472_v15 }
  0x3a   :  { %440 = vmatprep.subr.bf16.mxu0 %v534_v0 }
  0x3c   :  { %425 = vmatpush3.bf16.msra.mxu1 %v467_v10 }
  0x3d   :  { %426 = vmatprep.subr.bf16.mxu1 %v534_v0  ;;  %441 = vmatpush3.bf16.msra.mxu0 %v473_v16 }
  0x3e   :  { %442 = vmatprep.subr.bf16.mxu0 %v534_v0 }
  0x40   :  { %427 = vmatpush3.bf16.msra.mxu1 %v468_v11 }
  0x41   :  { %428 = vmatprep.subr.bf16.mxu1 %v534_v0  ;;  %443 = vmatpush3.bf16.msra.mxu0 %v474_v17 }
  0x42   :  { %444 = vmatprep.subr.bf16.mxu0 %v534_v0 }
  0x44   :  { %429 = vmatpush3.bf16.msra.mxu1 %v469_v12 }
  0x45   :  { %445 = vmatpush3.bf16.msra.mxu0 %v475_v18 }
  0x46   :  { %446 = vmatprep.subr.bf16.mxu0 %v534_v0 }
  0x49   :  { %447 = vmatpush3.bf16.msra.mxu0 %v476_v27 }
  0x4a   :  { %448 = vmatprep.subr.bf16.mxu0 %v534_v0 }
  0x4d   :  { %449 = vmatpush3.bf16.msra.mxu0 %v477_v28 }
 0x102   :  { %v118_v20 = vpop.f32.mrb[0].mxu0 }
 0x103   :  { %v119_v21 = vadd.f32 %v363_v19, %v118_v20  ;;  %v412_v22 = vpop.f32.mrb[1].mxu0 }
 0x104   :  { %v121_v23 = vpop.f32.mrb[2].mxu0 }
 0x105   :  { %v124_v24 = vmax.f32 %v119_v21, 0.0  ;;  %v413_v25 = vpop.f32.mrb[3].mxu0 }
 0x107   :  { %v125_v26 = vpack.c.bf16 %v124_v24, %v124_v24 }
 0x109   :  { %431 = vmatmul.mubr.bf16.vlgmr.msra.gmra.mrb[0].mxu1 %v125_v26 }
 0x1dc   :  { %v231_v30 = vpop.f32.mrb[0].mxu1 }
 0x1dd   :  { %v232_v31 = vadd.f32 %v367_v29, %v231_v30  ;;  %v432_v32 = vpop.f32.mrb[1].mxu1 }
 0x1de   :  { %v234_v33 = vpop.f32.mrb[2].mxu1 }
 0x1df   :  { %v237_v34 = vmax.f32 %v232_v31, 0.0  ;;  %v433_v35 = vpop.f32.mrb[3].mxu1 }
 0x1e1   :  { %v238_v36 = vpack.c.bf16 %v237_v34, %v237_v34 }
 0x1e3   :  { %451 = vmatmul.mubr.bf16.vlgmr.msra.gmra.mrb[4].mxu0 %v238_v36 }
 0x2b6   :  { %v344_v38 = vpop.f32.mrb[4].mxu0 }
 0x2b7   :  { %v345_v39 = vadd.f32 %v376_v37, %v344_v38  ;;  %v452_v40 = vpop.f32.mrb[5].mxu0 }
 0x2b8   :  { %v347_v41 = vpop.f32.mrb[6].mxu0 }
 0x2b9   :  { %v350_v42 = vsub.f32 0.0, %v345_v39  ;;  %v453_v43 = vpop.f32.mrb[7].mxu0 }
 0x2bb   :  { %v351_v44 = vmul.f32 1.442695, %v350_v42 }
 0x2bd   :  { %478 = vpow2.f32 %v351_v44 }
 0x2c7   :  { %v479_v45 = vpop.eup %478 }
 0x2c8   :  { %v353_v46 = vadd.f32 1.0, %v479_v45 }
 0x2ca   :  { %480 = vrcp.f32 %v353_v46 }
 0x2d4   :  { %v481_v47 = vpop.eup %480 }
 0x2d5   :  { %v355_v48 = vpack.c.bf16 %v481_v47, %v481_v47 }
 0x2d7   :  { %356 = vst [vmem:[%s652_s7] sm:$0xf] %v355_v48 }
 0x2d8   :  { %361 = vsyncpa [#allocation3], 1 }
 0x2d9   :  { %362 = vsyncpa [#allocation5], 1 }

</bundles_post_ra>
